<compile_context>
chip_gen: v6e
topology: v6e:2x2x1
jax: 0.10.0
libtpu: 0.0.40
codegen_flags: <defaults>
</compile_context>

<pallas_src>
import math

import jax
import jax.numpy as jnp
from jax.experimental import pallas as pl
from jax.experimental.pallas import tpu as pltpu

_LANE = 128
_VMEM_BUDGET = 40 * 1024 * 1024   # conservative: v7x has 64 MiB per TensorCore


def _round_up(x, m):
    return -(-x // m) * m


def _sublane_multiple(dtype):
    # Minimum second-to-last tile dim: 8 for 32-bit, 16 for 16-bit dtypes.
    return 16 if jnp.dtype(dtype).itemsize == 2 else 8


def _largest_divisor_tile(total, unit, cap):
    """Largest multiple of `unit` that divides `total` and is <= cap."""
    best = unit
    d = unit
    limit = min(total, cap)
    while d <= limit:
        if total % d == 0:
            best = d
        d += unit
    return best


# ---------------------------------------------------------------------------
# Kernels: one full-K MXU dot per (i, j) output tile.
#   x tile: (tm, K)   weight tile: (K, tn)  (weight pre-transposed at init)
# ---------------------------------------------------------------------------
def _linear_kernel(x_ref, w_ref, o_ref):
    o_ref[...] = jnp.dot(
        x_ref[...], w_ref[...], preferred_element_type=jnp.float32
    ).astype(o_ref.dtype)


def _linear_bias_kernel(x_ref, w_ref, b_ref, o_ref):
    acc = jnp.dot(x_ref[...], w_ref[...], preferred_element_type=jnp.float32)
    o_ref[...] = (acc + b_ref[...]).astype(o_ref.dtype)   # b_ref is f32 (1, tn)


# ---------------------------------------------------------------------------
# Parameter init / one-time preparation
# ---------------------------------------------------------------------------
def init_linear_norm_params(key, in_features, out_features, bias=False):
    """xavier_uniform_ weight (PyTorch (out, in) layout) + zero bias."""
    bound = math.sqrt(6.0 / (in_features + out_features))
    w = jax.random.uniform(
        key, (out_features, in_features), jnp.float32, minval=-bound, maxval=bound
    )
    b = jnp.zeros((out_features,), jnp.float32) if bias else None
    return w, b


def prepare_linear_params(weight, bias=None, *, compute_dtype=jnp.bfloat16):
    """One-time parameter prep (amortized over every forward call):

      * cast the weight to the MXU compute dtype (bf16 by default),
      * transpose to (in_features, out_features) so the in-kernel dot is a
        plain (tm,K)@(K,tn) with no trans_b layout shuffle,
      * zero-pad K/N up to lane multiples (a no-op for typical WaveNet dims),
      * keep the bias in f32, reshaped/padded to (1, N_padded).
    """
    n, k = weight.shape
    kp = _round_up(k, _LANE)
    np_ = _round_up(n, _LANE)
    w_t = weight.T.astype(compute_dtype)              # (K, N)
    if (kp, np_) != (k, n):
        w_t = jnp.pad(w_t, ((0, kp - k), (0, np_ - n)))
    b_row = None
    if bias is not None:
        b_row = bias.astype(jnp.float32).reshape(1, n)
        if np_ != n:
            b_row = jnp.pad(b_row, ((0, 0), (0, np_ - n)))
    return {"w_t": w_t, "bias": b_row, "in_features": k, "out_features": n}


# ---------------------------------------------------------------------------
# Forward
# ---------------------------------------------------------------------------
def linear_norm_apply(x, params, *, max_tm=1024, max_tn=1024, use_pallas=None):
    """y = x @ W^T (+ b) with params from prepare_linear_params."""
    w_t = params["w_t"]
    b_row = params["bias"]
    k = params["in_features"]
    n = params["out_features"]
    kp, np_ = w_t.shape
    compute_dtype = w_t.dtype

    *lead, k_x = x.shape
    assert k_x == k, "in_features mismatch"
    out_dtype = x.dtype
    m = math.prod(lead) if lead else 1

    if use_pallas is None:
        # Tiny problems: per-call / per-grid-step overhead dominates -> plain XLA.
        use_pallas = (m * n * k) >= (128 * 128 * 128)

    # ---- Tile selection ----------------------------------------------------
    sub = _sublane_multiple(compute_dtype)
    in_b = jnp.dtype(compute_dtype).itemsize
    out_b = jnp.dtype(out_dtype).itemsize

    tn = _largest_divisor_tile(np_, _LANE, max_tn)      # divisor of np_: no N over-pad
    tm = min(max_tm, _round_up(m, sub))

    def _footprint(tm_, tn_):
        # Double-buffered x / w / out tiles (+ bias tile).
        fp = 2 * (tm_ * kp * in_b + kp * tn_ * in_b + tm_ * tn_ * out_b)
        if b_row is not None:
            fp += 2 * tn_ * 4
        return fp

    while _footprint(tm, tn) > _VMEM_BUDGET and tm > sub:
        tm = max(sub, _round_up(tm // 2, sub))

    if _footprint(tm, tn) > _VMEM_BUDGET:
        # TODO(synk): add a K-grid accumulator path for very large in_features.
        use_pallas = False

    if not use_pallas:
        x2d = x.reshape(m, k).astype(compute_dtype)
        y2d = jnp.dot(x2d, w_t[:k, :n], preferred_element_type=jnp.float32)
        if b_row is not None:
            y2d = y2d + b_row[:, :n]
        return y2d.astype(out_dtype).reshape(*lead, n)

    # v7x megacore: prefer >= 2 tiles on the parallel M axis so both
    # TensorCores get work (harmless on single-TC v5e / v6e).
    if _round_up(m, tm) // tm < 2 and m >= 2 * sub:
        tm = _round_up(-(-m // 2), sub)
    mp = _round_up(m, tm)

    # ---- Operand staging: cast x + cheap M/K pad; weight already prepared ---
    x2d = x.reshape(m, k)
    if x2d.dtype != compute_dtype:
        x2d = x2d.astype(compute_dtype)
    if (mp, kp) != (m, k):
        x2d = jnp.pad(x2d, ((0, mp - m), (0, kp - k)))

    n_j = np_ // tn
    n_i = mp // tm
    grid = (n_j, n_i)                       # j (over N) outer, i (over M) inner
    # M innermost + weight index_map a function of j only => the weight block
    # index is unchanged across the inner M loop, so Pallas skips its DMA and
    # each weight tile is fetched from HBM once per j.
    x_spec = pl.BlockSpec((tm, kp), lambda j, i: (i, 0))
    w_spec = pl.BlockSpec((kp, tn), lambda j, i: (0, j))
    o_spec = pl.BlockSpec((tm, tn), lambda j, i: (i, j))
    out_shape = jax.ShapeDtypeStruct((mp, np_), out_dtype)

    cost = pl.CostEstimate(
        flops=2 * mp * np_ * kp,
        transcendentals=0,
        bytes_accessed=(n_j * mp * kp + np_ * kp) * in_b + mp * np_ * out_b,
    )
    cparams = pltpu.CompilerParams(
        dimension_semantics=("parallel", "parallel"),
        vmem_limit_bytes=int(min(max(4 * _footprint(tm, tn), 16 << 20), 48 << 20)),
    )

    if b_row is None:
        y2d = pl.pallas_call(
            _linear_kernel,
            out_shape=out_shape,
            grid_spec=pltpu.PrefetchScalarGridSpec(
                num_scalar_prefetch=0,
                grid=grid,
                in_specs=[x_spec, w_spec],
                out_specs=o_spec,
            ),
            compiler_params=cparams,
            cost_estimate=cost,
        )(x2d, w_t)
    else:
        b_spec = pl.BlockSpec((1, tn), lambda j, i: (0, j))
        y2d = pl.pallas_call(
            _linear_bias_kernel,
            out_shape=out_shape,
            grid_spec=pltpu.PrefetchScalarGridSpec(
                num_scalar_prefetch=0,
                grid=grid,
                in_specs=[x_spec, w_spec, b_spec],
                out_specs=o_spec,
            ),
            compiler_params=cparams,
            cost_estimate=cost,
        )(x2d, w_t, b_row)

    if mp != m:
        y2d = y2d[:m]       # contiguous prefix slice (cheap)
    if np_ != n:
        y2d = y2d[:, :n]    # only when out_features isn't a lane multiple
    return y2d.reshape(*lead, n)


def linear_norm(x, weight, bias=None, *, compute_dtype=jnp.bfloat16, **kwargs):
    """Drop-in LinearNorm.forward taking the native (out, in) weight.
    For repeated calls, prepare params once and use linear_norm_apply."""
    params = prepare_linear_params(weight, bias, compute_dtype=compute_dtype)
    return linear_norm_apply(x, params, **kwargs)


if __name__ == "__main__":
    key = jax.random.PRNGKey(0)
    k1, k2, k3, k4 = jax.random.split(key, 4)

    # --- Test 1: small module-scale shape, f32 compute, forced Pallas path
    # (exercises M/K/N padding + the 2-tile M grid). ---------------------------
    batch, seq, cin, cout = 2, 8, 32, 64
    x_s = jax.random.normal(k1, (batch, seq, cin), dtype=jnp.float32)
    w_s, b_s = init_linear_norm_params(k2, cin, cout, bias=False)
    p_s = prepare_linear_params(w_s, b_s, compute_dtype=jnp.float32)
    y_s = jax.block_until_ready(linear_norm_apply(x_s, p_s, use_pallas=True))
    y_s_ref = jnp.einsum("bsk,nk->bsn", x_s, w_s)
    assert y_s.shape == (batch, seq, cout)
    assert jnp.allclose(y_s, y_s_ref, atol=1e-2, rtol=1e-2)

    # --- Test 2: WaveNet-ish shape with bias, default bf16 compute path
    # (no K padding: kp == 384; weight resident per N tile). -------------------
    batch, seq, cin, cout = 2, 256, 384, 512
    x_l = jax.random.normal(k3, (batch, seq, cin), dtype=jnp.float32)
    w_l, b_l = init_linear_norm_params(k4, cin, cout, bias=True)
    p_bf16 = prepare_linear_params(w_l, b_l)                    # bf16 by default
    y_bf = jax.block_until_ready(linear_norm_apply(x_l, p_bf16))
    y_l_ref = jnp.einsum("bsk,nk->bsn", x_l, w_l) + b_l
    assert y_bf.shape == (batch, seq, cout)
    assert y_bf.dtype == x_l.dtype
    assert jnp.allclose(y_bf, y_l_ref, atol=5e-2, rtol=5e-2)

    # --- Test 3: same shape, f32 compute path (tighter numerical check). -----
    p_f32 = prepare_linear_params(w_l, b_l, compute_dtype=jnp.float32)
    y_f32 = jax.block_until_ready(linear_norm_apply(x_l, p_f32))
    assert jnp.allclose(y_f32, y_l_ref, atol=1e-2, rtol=1e-2)

    print("KERNEL_OK")
</pallas_src>

<mosaic_0001>
module attributes {stable_mosaic.version = 11 : i64} {
  func.func @_linear_kernel(%arg0: i32, %arg1: i32, %arg2: memref<8x128xf32, #tpu.memory_space<vmem>>, %arg3: memref<128x128xf32, #tpu.memory_space<vmem>>, %arg4: memref<8x128xf32, #tpu.memory_space<vmem>>) attributes {dimension_semantics = [#tpu.dimension_semantics<parallel>, #tpu.dimension_semantics<parallel>], iteration_bounds = array<i64: 1, 2>, scalar_prefetch = 0 : i64, scratch_operands = 0 : i64, tpu.core_type = #tpu.core_type<tc>, window_params = [{transform_indices = @transform_0, window_bounds = array<i64: 8, 128>}, {transform_indices = @transform_1, window_bounds = array<i64: 128, 128>}, {transform_indices = @transform_2, window_bounds = array<i64: 8, 128>}]} {
    %c0 = arith.constant 0 : index
    %c0_0 = arith.constant 0 : index
    %0 = vector.load %arg2[%c0, %c0_0] : memref<8x128xf32, #tpu.memory_space<vmem>>, vector<8x128xf32>
    %c0_1 = arith.constant 0 : index
    %c0_2 = arith.constant 0 : index
    %1 = vector.load %arg3[%c0_1, %c0_2] : memref<128x128xf32, #tpu.memory_space<vmem>>, vector<128x128xf32>
    %cst = arith.constant dense<0.000000e+00> : vector<8x128xf32>
    %2 = tpu.matmul %0, %1, %cst {dimension_numbers = #tpu.dot_dimension_numbers<[1], [0], [0], [1], [0, 0, 1, 1], [], []>} : vector<8x128xf32>, vector<128x128xf32>, vector<8x128xf32> -> vector<8x128xf32>
    %c0_3 = arith.constant 0 : index
    %c0_4 = arith.constant 0 : index
    %3 = vector.load %arg4[%c0_3, %c0_4] : memref<8x128xf32, #tpu.memory_space<vmem>>, vector<8x128xf32>
    tpu.vector_store %arg4[%c0_3, %c0_4], %2 {strides = array<i32>} : memref<8x128xf32, #tpu.memory_space<vmem>>, vector<8x128xf32>,
    return
  }
  func.func @transform_0(%arg0: i32, %arg1: i32) -> (i32, i32) {
    %c0_i32 = arith.constant 0 : i32
    %c0_i32_0 = arith.constant 0 : i32
    return %arg1, %c0_i32 : i32, i32
  }
  func.func @transform_1(%arg0: i32, %arg1: i32) -> (i32, i32) {
    %c0_i32 = arith.constant 0 : i32
    %c0_i32_0 = arith.constant 0 : i32
    return %c0_i32, %arg0 : i32, i32
  }
  func.func @transform_2(%arg0: i32, %arg1: i32) -> (i32, i32) {
    %c0_i32 = arith.constant 0 : i32
    return %arg1, %arg0 : i32, i32
  }
}

</mosaic_0001>

<bundles_post_ra>
// kernel: tpu_custom_call.1
= control target key start
LH: loop header
LB: loop body
LE: loop exit
PB: predicated region body
PF: predicated region fallthrough
CT: control target
= control target key end

     0   :  { %7 = vsyncpa [#allocation3], 0  ;;  %s881_s0 = inlined_call_operand.hbm [shape: f32[16,128], index: 0, kind: input, shape index: {}]   ;;  %s882_s1 = inlined_call_operand.hbm [shape: f32[128,128], index: 1, kind: input, shape index: {}]   ;;  %s883_s2 = inlined_call_operand.hbm [shape: f32[16,128], index: 2, kind: output, shape index: {}]  }
   0x1   :  { %9 = vsyncpa [#allocation3 + $0x1], 0 }
   0x2   :  { %10 = vsyncpa [#allocation6], 0 }
   0x3   :  { %11 = vsyncpa [#allocation4], 0 }
   0x4   :  { %13 = vsyncpa [#allocation4 + $0x1], 0  ;;  %s695_s9 = smov 0   ;;  %s697_s10 = smov 0  }
   0x5   :  { %s699_s11 = smov 0   ;;  %s701_s12 = smov 0  }
   0x6   :  { %s703_s13 = smov 0   ;;  %s705_s14 = smov 0  }
   0x7 LB: > { %s389_s15 = sadd.s32 4294967295, %s671_s14   ;;  %s390_s16 = sadd.s32 4294967294, %s671_s14   ;;  %s671_s14 = sphi %s705_s14, %s19_s14   ;;  %s667_s13 = sphi %s703_s13, %s901_s13   ;;  %s663_s12 = sphi %s701_s12, %s900_s12   ;;  %s659_s11 = sphi %s699_s11, %s899_s11   ;;  %s655_s10 = sphi %s697_s10, %s898_s10   ;;  %s651_s9 = sphi %s695_s9, %s897_s9  }
   0x8   : > { %p51_p0 = scmp.ne.s32.totalorder %s655_s10, %s651_s9  ;;  %p729_p1 = scmp.eq.s32.totalorder %s389_s15, 0 }
   0x9   : > { %p733_p2 = scmp.eq.s32.totalorder %s389_s15, 1  ;;  %p109_p3 = scmp.eq.s32.totalorder %s390_s16, 1 }
   0xa   : > { %p739_p4 = por %p729_p1, %p51_p0  ;;  %p391_p5 = scmp.ge.s32.totalorder %s671_s14, 1 }
   0xb   : > { %p744_p6 = por %p109_p3, %p51_p0  ;;  %p116_p7 = scmp.lt.s32.totalorder %s671_s14, 3 }
   0xc   : > { %s887_s19 = scalar_select %p739_p4, 1, 0 }
   0xd   : > { %s888_s20 = scalar_select %p744_p6, 1, 0 }
   0xe   : > { %p749_p8 = pnand %p391_p5, %p116_p7  ;;  %s673_s22 = smov [#allocation5]  }
   0xf   : > { %s130_s23 = sshll.u32 %s673_s22, 4  ;;  %s28_s25 = sadd.s32 1, %s667_s13  ;;  %s131_s23 = int_to_ptr.vmem [resolvable:$true] %s130_s23 }
  0x10   : > { %p464_p9 = pneg %p749_p8  ;;  %s544_s26 = scalar_lea.vmem %s131_s23, 2048 }
  0x11   : > { %p545_p13 = scmp.ne.s32.totalorder %s131_s23, %s544_s26  ;;  %p552_p5 = scmp.lt.s32.totalorder %s131_s23, %s131_s23 }
  0x12   : > { %p758_p11 = pnand %p464_p9, %p729_p1  ;;  %p553_p7 = scmp.lt.s32.totalorder %s544_s26, %s544_s26 }
  0x14   : > { %p535_p12 = pneg %p758_p11  ;;  %p554_p6 = por %p553_p7, %p552_p5 }
  0x16   : > { %p547_p0 = pnand %p545_p13, %p535_p12 }
  0x18   : > { %p548_p3 = pneg %p547_p0 }
  0x1a   : > { %p555_p4 = pnand %p554_p6, %p548_p3 }
  0x1c   : > { %558 = shalt.err (!%p555_p4)
}
  0x1d   : > { %s674_s27 = smov 128   ;;  %s675_s28 = smov 8  }
  0x1e   : > { %467 = dma.hbm_to_vmem [thread:$0]  (!%p758_p11), %s882_s1, 2048, %s131_s23, [#allocation6], %s674_s27, %s674_s27, %s675_s28  }
  0x1f   : > { %p29_p6 = scmp.ge.s32.totalorder %s28_s25, 2  ;;  %s38_s3 = sadd.s32 1, %s659_s11 }
  0x20   : > { %p45_p4 = scmp.ne.s32.totalorder %s659_s11, %s655_s10  ;;  %p46_p9 = scmp.eq.s32.totalorder %s671_s14, 0 }
  0x21   : > { %s903_s25 = smov (%p29_p6, %s28_s25), 0  ;;  %p477_p0 = scmp.lt.s32.totalorder %s671_s14, 2 }
  0x22   : > { %p776_p12 = por %p46_p9, %p45_p4  ;;  %p782_p13 = por %p733_p2, %p45_p4 }
  0x23   : > { %s35_s6 = ssub.s32 %s667_s13, %s903_s25  ;;  %s144_s7 = sand.u32 1, %s659_s11  }
  0x24   : > { %p36_p11 = scmp.eq.s32.totalorder %s35_s6, 0  ;;  %s394_s8 = sshll.u32 %s144_s7, 3 }
  0x25   : > { %s395_s16 = sshll.u32 %s667_s13, 7  ;;  %s148_s26 = scalar_lea.vmem [#allocation2], %s394_s8 }
  0x26   : > { %s791_s15 = scalar_select %p36_p11, %s659_s11, %s38_s3  }
  0x27   : > { %s153_s24 = scalar_lea.hbm %s881_s0, %s395_s16  ;;  %s155_s27 = sshll.u32 %s148_s26, 4  ;;  %s156_s27 = int_to_ptr.vmem [resolvable:$true] %s155_s27 }
  0x28   : > { %p799_p2 = pnand %p477_p0, %p776_p12  ;;  %s145_s28 = scalar_lea.sflag [#allocation3], %s144_s7 }
  0x29   : > { %s572_s29 = scalar_lea.vmem %s156_s27, 128  ;;  %s676_s30 = smov [#allocation2]  }
  0x2a   : > { %p561_p3 = pneg %p799_p2  ;;  %p573_p5 = scmp.ne.s32.totalorder %s156_s27, %s572_s29 }
  0x2b   : > { %s577_s3 = sshll.u32 %s676_s30, 4  ;;  %s578_s3 = int_to_ptr.vmem [resolvable:$false] %s577_s3 }
  0x2c   : > { %p575_p7 = pnand %p573_p5, %p561_p3  ;;  %s579_s6 = scalar_lea.vmem %s578_s3, 256 }
  0x2d   : > { %p580_p4 = scmp.lt.s32.totalorder %s156_s27, %s578_s3  ;;  %p581_p9 = scmp.lt.s32.totalorder %s579_s6, %s572_s29 }
  0x2e   : > { %p576_p6 = pneg %p575_p7 }
  0x2f   : > { %p582_p11 = por %p581_p9, %p580_p4 }
  0x31   : > { %p583_p10 = pnand %p582_p11, %p576_p6 }
  0x33   : > { %586 = shalt.err (!%p583_p10)
}
  0x34   : > { %471 = dma.hbm_to_vmem [thread:$0]  (!%p799_p2), %s153_s24, 128, %s156_s27, %s145_s28  }
  0x35   : > { %164 = sbr.rel (%p749_p8) target bundleno = 301 (0x12d), region = 28  ;;  %s810_s4 = sand.u32 (!%p749_p8), 1, %s655_s10  }
  0x36   : > { %s397_s7 = sshll.u32 (!%p749_p8), %s810_s4, 3  ;;  %s167_s8 = scalar_lea.sflag (!%p749_p8), [#allocation3], %s810_s4 }
  0x37   : > { %s816_s16 = scalar_lea.vmem (!%p749_p8), [#allocation2], %s397_s7  ;;  %p894_p12 = scmp.ne.s32.totalorder (!%p749_p8), %s887_s19, 0 }
  0x3a   : > { %638 = dma.done.wait (%p894_p12), %s167_s8, 128  }
  0x3b   : > { %640 = vsyncadd (%p894_p12), %s167_s8, 4294967168 }
  0x3c   : > { %642 = dma.done.wait (%p729_p1), [#allocation6], 2048  }
  0x3d   : > { %644 = vsyncadd (%p729_p1), [#allocation6], 4294965248  ;;  %v677_v0 = vmov 0.0   ;;  %vm678_vm0 = vmmov 0   ;;  %v211_v1 = vld [vmem:[#allocation5 + $0x78] sm:$0xff]  ;;  %v210_v2 = vld [vmem:[#allocation5 + $0x70] sm:$0xff] }
  0x3e   : > { %421 = vmatprep.subr.mxu0 %v677_v0  ;;  %453 = vmatprep.mubr.msk.f32.mxu0 %vm678_vm0, %v677_v0  ;;  %v209_v3 = vld [vmem:[#allocation5 + $0x68] sm:$0xff]  ;;  %v208_v4 = vld [vmem:[#allocation5 + $0x60] sm:$0xff]  ;;  %v207_v5 = vld [vmem:[#allocation5 + $0x58] sm:$0xff]  ;;  %s194_s17 = scalar_lea.vmem [#allocation7], %s397_s7  ;;  %s401_s21 = sshll.u32 %s663_s12, 7 }
  0x3f   : > { %422 = vmatpush3.msra.mxu0 %v211_v1  ;;  %v206_v6 = vld [vmem:[#allocation5 + $0x50] sm:$0xff]  ;;  %v205_v7 = vld [vmem:[#allocation5 + $0x48] sm:$0xff]  ;;  %v204_v8 = vld [vmem:[#allocation5 + $0x40] sm:$0xff]  ;;  %s298_s19 = sshll.u32 %s194_s17, 4  ;;  %s835_s24 = scalar_lea.hbm %s883_s2, %s401_s21  ;;  %s830_s19 = int_to_ptr.vmem [resolvable:$true] %s298_s19 }
  0x40   : > { %423 = vmatprep.subr.mxu0 %v677_v0  ;;  %v203_v9 = vld [vmem:[#allocation5 + $0x38] sm:$0xff]  ;;  %v202_v10 = vld [vmem:[#allocation5 + $0x30] sm:$0xff]  ;;  %v201_v11 = vld [vmem:[#allocation5 + $0x28] sm:$0xff]  ;;  %s284_s26 = scalar_lea.sflag [#allocation4], %s810_s4  ;;  %s587_s27 = scalar_lea.vmem %s830_s19, 128 }
  0x41   : > { %424 = vmatpush3.msra.mxu0 %v210_v2  ;;  %v200_v12 = vld [vmem:[#allocation5 + $0x20] sm:$0xff]  ;;  %v199_v13 = vld [vmem:[#allocation5 + $0x18] sm:$0xff]  ;;  %v198_v14 = vld [vmem:[#allocation5 + $0x10] sm:$0xff]  ;;  %p588_p1 = scmp.ne.s32.totalorder %s830_s19, %s587_s27  ;;  %s679_s12 = smov [#allocation7]  }
  0x42   : > { %425 = vmatprep.subr.mxu0 %v677_v0  ;;  %v197_v15 = vld [vmem:[#allocation5 + $0x8] sm:$0xff]  ;;  %v196_v16 = vld [vmem:[#allocation5] sm:$0xff]  ;;  %v195_v17 = vld [vmem:[%s816_s16] sm:$0xff]  ;;  %s591_s18 = sshll.u32 %s679_s12, 4  ;;  %s592_s18 = int_to_ptr.vmem [resolvable:$false] %s591_s18 }
  0x43   : > { %426 = vmatpush3.msra.mxu0 %v209_v3  ;;  %p589_p8 = pnand %p588_p1, %p782_p13  ;;  %s593_s28 = scalar_lea.vmem %s592_s18, 256 }
  0x44   : > { %427 = vmatprep.subr.mxu0 %v677_v0  ;;  %p594_p0 = scmp.lt.s32.totalorder %s830_s19, %s592_s18  ;;  %p595_p2 = scmp.lt.s32.totalorder %s593_s28, %s587_s27 }
  0x45   : > { %428 = vmatpush3.msra.mxu0 %v208_v4  ;;  %p590_p10 = pneg %p589_p8 }
  0x46   : > { %429 = vmatprep.subr.mxu0 %v677_v0  ;;  %p596_p3 = por %p595_p2, %p594_p0 }
  0x47   : > { %430 = vmatpush3.msra.mxu0 %v207_v5 }
  0x48   : > { %431 = vmatprep.subr.mxu0 %v677_v0  ;;  %p597_p5 = pnand %p596_p3, %p590_p10 }
  0x49   : > { %432 = vmatpush3.msra.mxu0 %v206_v6 }
  0x4a   : > { %433 = vmatprep.subr.mxu0 %v677_v0 }
  0x4b   : > { %434 = vmatpush3.msra.mxu0 %v205_v7 }
  0x4c   : > { %435 = vmatprep.subr.mxu0 %v677_v0 }
  0x4d   : > { %436 = vmatpush3.msra.mxu0 %v204_v8 }
  0x4e   : > { %437 = vmatprep.subr.mxu0 %v677_v0 }
  0x4f   : > { %438 = vmatpush3.msra.mxu0 %v203_v9 }
  0x50   : > { %439 = vmatprep.subr.mxu0 %v677_v0 }
  0x51   : > { %440 = vmatpush3.msra.mxu0 %v202_v10 }
  0x52   : > { %441 = vmatprep.subr.mxu0 %v677_v0 }
  0x53   : > { %442 = vmatpush3.msra.mxu0 %v201_v11 }
  0x54   : > { %443 = vmatprep.subr.mxu0 %v677_v0 }
  0x55   : > { %444 = vmatpush3.msra.mxu0 %v200_v12 }
  0x56   : > { %445 = vmatprep.subr.mxu0 %v677_v0 }
  0x57   : > { %446 = vmatpush3.msra.mxu0 %v199_v13 }
  0x58   : > { %447 = vmatprep.subr.mxu0 %v677_v0 }
  0x59   : > { %448 = vmatpush3.msra.mxu0 %v198_v14 }
  0x5a   : > { %449 = vmatprep.subr.mxu0 %v677_v0 }
  0x5b   : > { %450 = vmatpush3.msra.mxu0 %v197_v15 }
  0x5c   : > { %451 = vmatprep.subr.mxu0 %v677_v0 }
  0x5d   : > { %452 = vmatpush3.msra.mxu0 %v196_v16 }
  0x5e   : > { %454 = vmatmul.mubr.f32.vlgmr.msra.gmra.mxu0 %v195_v17 }
 0x11e   : > { %v278_v18 = vpop.f32.mrf.mxu0 }
 0x11f   : > { %282 = vst [vmem:[%s194_s17] sm:$0xff] %v278_v18 }
 0x120   : > { %v455_v19 = vpop.f32.mrf.mxu0 }
 0x121   : > { %600 = shalt.err (!%p597_p5)
}
 0x122   : > { %s601_s29 = scalar_lea.hbm %s835_s24, 128  ;;  %s605_s6 = scalar_lea.hbm %s883_s2, 256 }
 0x123   : > { %p602_p7 = scmp.ne.s32.totalorder %s835_s24, %s601_s29  ;;  %p606_p9 = scmp.lt.s32.totalorder %s835_s24, %s883_s2 }
 0x124   : > { %p607_p11 = scmp.lt.s32.totalorder %s605_s6, %s601_s29 }
 0x125   : > { %p603_p6 = pnand %p602_p7, %p782_p13 }
 0x126   : > { %p608_p12 = por %p607_p11, %p606_p9 }
 0x127   : > { %p604_p4 = pneg %p603_p6 }
 0x129   : > { %p609_p1 = pnand %p608_p12, %p604_p4 }
 0x12b   : > { %612 = shalt.err (!%p609_p1)
}
 0x12c   : > { %462 = dma.vmem_to_hbm [thread:$0]  (%p782_p13), %s830_s19, 128, %s835_s24, %s284_s26  }
 0x12d PF: > { %s310_s8 = sand.u32 1, %s651_s9   ;;  %p895_p8 = scmp.ne.s32.totalorder %s888_s20, 0 }
 0x12e   : > { %p896_p10 = scmp.ge.s32.totalorder %s671_s14, 2  ;;  %s311_s16 = scalar_lea.sflag [#allocation4], %s310_s8 }
 0x130   : > { %p473_p0 = pnand %p896_p10, %p895_p8 }
 0x132   : > { %p474_p2 = pneg %p473_p0 }
 0x134   : > { %646 = dma.done.wait (%p474_p2), %s311_s16, 128  }
 0x135   : > { %648 = vsyncadd (%p474_p2), %s311_s16, 4294967168  ;;  %s19_s14 = sadd.s32 1, %s671_s14   ;;  %s897_s9 = smov %s655_s10 }
 0x136   : > { %p16_p3 = scmp.ge.s32.totalorder %s19_s14, 4   ;;  %s898_s10 = smov %s659_s11 }
 0x137   : > { %s899_s11 = smov %s791_s15  ;;  %s900_s12 = smov %s667_s13 }
 0x138   : > { %s901_s13 = smov %s903_s25  ;;  %18 = sbr.rel (!%p16_p3) target bundleno = 7 (0x7), region = 78 }
 0x13d   :  { %316 = vsyncpa [#allocation3], 1 }
 0x13e   :  { %318 = vsyncpa [#allocation3 + $0x1], 1 }
 0x13f   :  { %319 = vsyncpa [#allocation6], 1 }
 0x140   :  { %320 = vsyncpa [#allocation4], 1 }
 0x141   :  { %322 = vsyncpa [#allocation4 + $0x1], 1 }

</bundles_post_ra>
